<compile_context>
chip_gen: v5e
topology: v5e:2x2
jax: 0.10.0
libtpu: 0.0.40
codegen_flags: <defaults>
</compile_context>

<pallas_src>
import functools

import jax
import jax.numpy as jnp
from jax.experimental import pallas as pl
from jax.experimental.pallas import tpu as pltpu

N_OMICS = 5  # mut, exp, cna, meth, fprint


def fused_vae_deepdep_kernel(*refs):
    """Fully fused forward for one batch tile: 5 encoder mu-paths + head.

    Ref layout (all VMEM):
      refs[0:5]    : x_mut, x_exp, x_cna, x_meth, x_fprint   (bf16)
      refs[5:30]   : per-encoder (w1, b1, w2, b2, w_folded) x 5
                     w* in bf16, biases in f32,
                     w_folded = fc_mu.W @ fc_merged1.W[i*L:(i+1)*L]  [H2, DENSE]
      refs[30]     : folded fc_merged1 bias (incl. all mu biases)   [1, DENSE] f32
      refs[31:33]  : fc_merged2 weight (bf16) / bias (f32)
      refs[33:35]  : fc_out weight as a row [1, DENSE] f32 / bias [1, 1] f32
      refs[35]     : output ref                                    [TB, 1] f32
    """
    xs = refs[0:N_OMICS]
    enc = refs[N_OMICS:N_OMICS + 5 * N_OMICS]
    bh1 = refs[30]
    wh2, bh2 = refs[31], refs[32]
    wo_row, bo = refs[33], refs[34]
    o_ref = refs[35]

    batch = xs[0].shape[0]
    dense = bh1.shape[-1]

    # Accumulate fc_merged1 pre-activation directly; concat and mu are never
    # formed.  Initialise from the pre-folded bias (saves a zero-fill + add).
    acc = jnp.broadcast_to(bh1[...], (batch, dense)).astype(jnp.float32)
    for i in range(N_OMICS):
        w1, b1, w2, b2, fw = enc[5 * i:5 * i + 5]
        h1 = jnp.maximum(
            jnp.dot(xs[i][...], w1[...], preferred_element_type=jnp.float32)
            + b1[...], 0.0).astype(w2.dtype)
        h2 = jnp.maximum(
            jnp.dot(h1, w2[...], preferred_element_type=jnp.float32)
            + b2[...], 0.0).astype(fw.dtype)
        acc = acc + jnp.dot(h2, fw[...], preferred_element_type=jnp.float32)

    m1 = jnp.maximum(acc, 0.0).astype(wh2.dtype)
    m2 = jnp.maximum(
        jnp.dot(m1, wh2[...], preferred_element_type=jnp.float32) + bh2[...],
        0.0)
    # fc_out has N=1: VPU multiply + lane reduce instead of a wasted MXU pass.
    o_ref[...] = jnp.sum(m2 * wo_row[...], axis=-1, keepdims=True) + bo[...]


@functools.partial(jax.jit, static_argnames=("weight_dtype",))
def vae_deepdep_forward(mut, exp, cna, meth, fprint, params,
                        weight_dtype=jnp.bfloat16):
    """One pallas_call for the whole forward pass (deterministic mu path)."""
    xs_f32 = (mut, exp, cna, meth, fprint)
    batch = mut.shape[0]
    names = ("mut", "exp", "cna", "meth", "fprint")

    w_m1, b_m1, w_m2, b_m2, w_out, b_out = params["head"]
    latent = w_m1.shape[0] // N_OMICS
    dense = w_m1.shape[1]

    # Fold fc_mu into the fc_merged1 row-slices (exact algebra, done once in
    # f32): cat(mu_*) @ W_m1 == sum_i h2_i @ (W_mu_i @ W_m1[i*L:(i+1)*L]) + ...
    enc_args = []
    bh1_total = b_m1.astype(jnp.float32)
    for i, n in enumerate(names):
        w1, b1, w2, b2, wm, bm = params[n]
        sl = w_m1[i * latent:(i + 1) * latent, :].astype(jnp.float32)
        fw = wm.astype(jnp.float32) @ sl                       # [H2, DENSE]
        bh1_total = bh1_total + bm.astype(jnp.float32) @ sl    # [1, DENSE]
        enc_args.extend([
            w1.astype(weight_dtype), b1.astype(jnp.float32),
            w2.astype(weight_dtype), b2.astype(jnp.float32),
            fw.astype(weight_dtype),
        ])

    xs = tuple(x.astype(weight_dtype) for x in xs_f32)
    head_args = (
        bh1_total,
        w_m2.astype(weight_dtype), b_m2.astype(jnp.float32),
        w_out.reshape(1, dense).astype(jnp.float32),   # fc_out weight as a row
        b_out.astype(jnp.float32),
    )

    # Batch tiling: large batches get a 256-row "parallel" grid axis (pipelined
    # blocks; megacore sharding on v7x); small batches stay a single block.
    if batch > 256:
        tb = 256
        padded = pl.cdiv(batch, tb) * tb
        if padded != batch:
            pad = padded - batch
            xs = tuple(jnp.pad(x, ((0, pad), (0, 0))) for x in xs)
    else:
        tb = batch
        padded = batch
    grid = (padded // tb,)

    args = xs + tuple(enc_args) + head_args

    x_specs = [pl.BlockSpec((tb, x.shape[1]), lambda i: (i, 0)) for x in xs]
    # Weights/biases: constant block index -> stay resident across grid steps.
    w_specs = [pl.BlockSpec(a.shape, lambda i: (0, 0))
               for a in (tuple(enc_args) + head_args)]
    out_spec = pl.BlockSpec((tb, 1), lambda i: (i, 0))

    # Advisory cost estimate so XLA schedules the custom call tightly.
    flops = 0
    for x, n in zip(xs_f32, names):
        w1, _, w2, _, _, _ = params[n]
        flops += 2 * batch * (w1.shape[0] * w1.shape[1]
                              + w2.shape[0] * w2.shape[1]
                              + w2.shape[1] * dense)     # folded fc_mu∘merged1
    flops += 2 * batch * (dense * dense + dense * 1)
    bytes_accessed = int(sum(a.size * a.dtype.itemsize for a in args)
                         + padded * 4)

    # Resident footprint (weights + one batch tile, double-buffered xs/out) with
    # headroom; clamp to [32 MiB, 64 MiB] so it is safe on every generation.
    resident = int(sum(a.size * a.dtype.itemsize
                       for a in (tuple(enc_args) + head_args)))
    resident += 2 * int(sum(tb * x.shape[1] * x.dtype.itemsize for x in xs))
    resident += 2 * tb * 4
    vmem_limit = int(min(64 << 20, max(3 * resident, 32 << 20)))

    out = pl.pallas_call(
        fused_vae_deepdep_kernel,
        out_shape=jax.ShapeDtypeStruct((padded, 1), jnp.float32),
        grid=grid,
        in_specs=x_specs + w_specs,
        out_specs=out_spec,
        compiler_params=pltpu.CompilerParams(
            dimension_semantics=("parallel",),
            vmem_limit_bytes=vmem_limit),
        cost_estimate=pl.CostEstimate(
            flops=flops, transcendentals=0, bytes_accessed=bytes_accessed),
    )(*args)
    return out[:batch]


def vae_deepdep_reference(mut, exp, cna, meth, fprint, params):
    """Plain-JAX f32 reference (mirrors the PyTorch forward) for correctness."""
    def enc(x, p):
        w1, b1, w2, b2, wm, bm = p
        h1 = jnp.maximum(x @ w1 + b1, 0.0)
        h2 = jnp.maximum(h1 @ w2 + b2, 0.0)
        return h2 @ wm + bm

    mus = [enc(x, params[n]) for x, n in zip(
        (mut, exp, cna, meth, fprint), ("mut", "exp", "cna", "meth", "fprint"))]
    merged = jnp.concatenate(mus, axis=1)
    w_m1, b_m1, w_m2, b_m2, w_out, b_out = params["head"]
    m1 = jnp.maximum(merged @ w_m1 + b_m1, 0.0)
    m2 = jnp.maximum(m1 @ w_m2 + b_m2, 0.0)
    return m2 @ w_out + b_out


def init_linear(key, d_in, d_out, scale=0.05):
    """Deterministic synthetic params. Weight stored as [in, out]."""
    kw, kb = jax.random.split(key)
    w = scale * jax.random.normal(kw, (d_in, d_out), dtype=jnp.float32)
    b = scale * jax.random.normal(kb, (1, d_out), dtype=jnp.float32)
    return w, b


def init_encoder(key, d_in, d_h1, d_h2, d_latent):
    k1, k2, k3 = jax.random.split(key, 3)
    w1, b1 = init_linear(k1, d_in, d_h1)
    w2, b2 = init_linear(k2, d_h1, d_h2)
    wm, bm = init_linear(k3, d_h2, d_latent)
    return (w1, b1, w2, b2, wm, bm)


if __name__ == "__main__":
    key = jax.random.PRNGKey(0)
    ks = jax.random.split(key, 12)

    B = 8
    LATENT = 50            # 5 * 50 = 250 (matches nn.Linear(250, dense_layer_dim))
    DENSE = 100            # dense_layer_dim
    # small per-omics input dims
    D_MUT, D_EXP, D_CNA, D_METH, D_FPR = 64, 96, 64, 48, 80
    H1, H2 = 128, 64       # encoder hidden dims

    params = {
        "mut":    init_encoder(ks[0], D_MUT, H1, H2, LATENT),
        "exp":    init_encoder(ks[1], D_EXP, H1, H2, LATENT),
        "cna":    init_encoder(ks[2], D_CNA, H1, H2, LATENT),
        "meth":   init_encoder(ks[3], D_METH, H1, H2, LATENT),
        "fprint": init_encoder(ks[4], D_FPR, H1, H2, LATENT),
    }
    kw1, kw2, kw3 = jax.random.split(ks[5], 3)
    w1, b1 = init_linear(kw1, N_OMICS * LATENT, DENSE)  # fc_merged1: Linear(250, dense)
    w2, b2 = init_linear(kw2, DENSE, DENSE)             # fc_merged2: Linear(dense, dense)
    wo, bo = init_linear(kw3, DENSE, 1)                 # fc_out:     Linear(dense, 1)
    params["head"] = (w1, b1, w2, b2, wo, bo)

    mut = jax.random.normal(ks[6], (B, D_MUT), dtype=jnp.float32)
    exp = jax.random.normal(ks[7], (B, D_EXP), dtype=jnp.float32)
    cna = jax.random.normal(ks[8], (B, D_CNA), dtype=jnp.float32)
    meth = jax.random.normal(ks[9], (B, D_METH), dtype=jnp.float32)
    fprint = jax.random.normal(ks[10], (B, D_FPR), dtype=jnp.float32)

    out = vae_deepdep_forward(mut, exp, cna, meth, fprint, params)
    jax.block_until_ready(out)
    assert out.shape == (B, 1) and out.dtype == jnp.float32

    ref = vae_deepdep_reference(mut, exp, cna, meth, fprint, params)
    # bf16 weights/activations (f32 accumulation) -> relaxed tolerance vs the
    # f32 reference.
    assert jnp.allclose(out, ref, atol=2e-2, rtol=5e-2), (
        "Pallas output mismatch vs. reference: "
        f"max abs err {jnp.max(jnp.abs(out - ref))}")

    print("KERNEL_OK")
</pallas_src>

<mosaic_0001>
module attributes {stable_mosaic.version = 11 : i64} {
  func.func @fused_vae_deepdep_kernel(%arg0: i32, %arg1: memref<8x64xbf16, #tpu.memory_space<vmem>>, %arg2: memref<8x96xbf16, #tpu.memory_space<vmem>>, %arg3: memref<8x64xbf16, #tpu.memory_space<vmem>>, %arg4: memref<8x48xbf16, #tpu.memory_space<vmem>>, %arg5: memref<8x80xbf16, #tpu.memory_space<vmem>>, %arg6: memref<64x128xbf16, #tpu.memory_space<vmem>>, %arg7: memref<1x128xf32, #tpu.memory_space<vmem>>, %arg8: memref<128x64xbf16, #tpu.memory_space<vmem>>, %arg9: memref<1x64xf32, #tpu.memory_space<vmem>>, %arg10: memref<64x100xbf16, #tpu.memory_space<vmem>>, %arg11: memref<96x128xbf16, #tpu.memory_space<vmem>>, %arg12: memref<1x128xf32, #tpu.memory_space<vmem>>, %arg13: memref<128x64xbf16, #tpu.memory_space<vmem>>, %arg14: memref<1x64xf32, #tpu.memory_space<vmem>>, %arg15: memref<64x100xbf16, #tpu.memory_space<vmem>>, %arg16: memref<64x128xbf16, #tpu.memory_space<vmem>>, %arg17: memref<1x128xf32, #tpu.memory_space<vmem>>, %arg18: memref<128x64xbf16, #tpu.memory_space<vmem>>, %arg19: memref<1x64xf32, #tpu.memory_space<vmem>>, %arg20: memref<64x100xbf16, #tpu.memory_space<vmem>>, %arg21: memref<48x128xbf16, #tpu.memory_space<vmem>>, %arg22: memref<1x128xf32, #tpu.memory_space<vmem>>, %arg23: memref<128x64xbf16, #tpu.memory_space<vmem>>, %arg24: memref<1x64xf32, #tpu.memory_space<vmem>>, %arg25: memref<64x100xbf16, #tpu.memory_space<vmem>>, %arg26: memref<80x128xbf16, #tpu.memory_space<vmem>>, %arg27: memref<1x128xf32, #tpu.memory_space<vmem>>, %arg28: memref<128x64xbf16, #tpu.memory_space<vmem>>, %arg29: memref<1x64xf32, #tpu.memory_space<vmem>>, %arg30: memref<64x100xbf16, #tpu.memory_space<vmem>>, %arg31: memref<1x100xf32, #tpu.memory_space<vmem>>, %arg32: memref<100x100xbf16, #tpu.memory_space<vmem>>, %arg33: memref<1x100xf32, #tpu.memory_space<vmem>>, %arg34: memref<1x100xf32, #tpu.memory_space<vmem>>, %arg35: memref<1x1xf32, #tpu.memory_space<vmem>>, %arg36: memref<8x1xf32, #tpu.memory_space<vmem>>) attributes {dimension_semantics = [#tpu.dimension_semantics<parallel>], iteration_bounds = array<i64: 1>, scalar_prefetch = 0 : i64, scratch_operands = 0 : i64, tpu.core_type = #tpu.core_type<tc>, window_params = [{transform_indices = @transform_0, window_bounds = array<i64: 8, 64>}, {transform_indices = @transform_1, window_bounds = array<i64: 8, 96>}, {transform_indices = @transform_2, window_bounds = array<i64: 8, 64>}, {transform_indices = @transform_3, window_bounds = array<i64: 8, 48>}, {transform_indices = @transform_4, window_bounds = array<i64: 8, 80>}, {pipeline_mode = #tpu.pipeline_mode<synchronous>, transform_indices = @transform_5, window_bounds = array<i64: 64, 128>}, {pipeline_mode = #tpu.pipeline_mode<synchronous>, transform_indices = @transform_6, window_bounds = array<i64: 1, 128>}, {pipeline_mode = #tpu.pipeline_mode<synchronous>, transform_indices = @transform_7, window_bounds = array<i64: 128, 64>}, {pipeline_mode = #tpu.pipeline_mode<synchronous>, transform_indices = @transform_8, window_bounds = array<i64: 1, 64>}, {pipeline_mode = #tpu.pipeline_mode<synchronous>, transform_indices = @transform_9, window_bounds = array<i64: 64, 100>}, {pipeline_mode = #tpu.pipeline_mode<synchronous>, transform_indices = @transform_10, window_bounds = array<i64: 96, 128>}, {pipeline_mode = #tpu.pipeline_mode<synchronous>, transform_indices = @transform_11, window_bounds = array<i64: 1, 128>}, {pipeline_mode = #tpu.pipeline_mode<synchronous>, transform_indices = @transform_12, window_bounds = array<i64: 128, 64>}, {pipeline_mode = #tpu.pipeline_mode<synchronous>, transform_indices = @transform_13, window_bounds = array<i64: 1, 64>}, {pipeline_mode = #tpu.pipeline_mode<synchronous>, transform_indices = @transform_14, window_bounds = array<i64: 64, 100>}, {pipeline_mode = #tpu.pipeline_mode<synchronous>, transform_indices = @transform_15, window_bounds = array<i64: 64, 128>}, {pipeline_mode = #tpu.pipeline_mode<synchronous>, transform_indices = @transform_16, window_bounds = array<i64: 1, 128>}, {pipeline_mode = #tpu.pipeline_mode<synchronous>, transform_indices = @transform_17, window_bounds = array<i64: 128, 64>}, {pipeline_mode = #tpu.pipeline_mode<synchronous>, transform_indices = @transform_18, window_bounds = array<i64: 1, 64>}, {pipeline_mode = #tpu.pipeline_mode<synchronous>, transform_indices = @transform_19, window_bounds = array<i64: 64, 100>}, {pipeline_mode = #tpu.pipeline_mode<synchronous>, transform_indices = @transform_20, window_bounds = array<i64: 48, 128>}, {pipeline_mode = #tpu.pipeline_mode<synchronous>, transform_indices = @transform_21, window_bounds = array<i64: 1, 128>}, {pipeline_mode = #tpu.pipeline_mode<synchronous>, transform_indices = @transform_22, window_bounds = array<i64: 128, 64>}, {pipeline_mode = #tpu.pipeline_mode<synchronous>, transform_indices = @transform_23, window_bounds = array<i64: 1, 64>}, {pipeline_mode = #tpu.pipeline_mode<synchronous>, transform_indices = @transform_24, window_bounds = array<i64: 64, 100>}, {pipeline_mode = #tpu.pipeline_mode<synchronous>, transform_indices = @transform_25, window_bounds = array<i64: 80, 128>}, {pipeline_mode = #tpu.pipeline_mode<synchronous>, transform_indices = @transform_26, window_bounds = array<i64: 1, 128>}, {pipeline_mode = #tpu.pipeline_mode<synchronous>, transform_indices = @transform_27, window_bounds = array<i64: 128, 64>}, {pipeline_mode = #tpu.pipeline_mode<synchronous>, transform_indices = @transform_28, window_bounds = array<i64: 1, 64>}, {pipeline_mode = #tpu.pipeline_mode<synchronous>, transform_indices = @transform_29, window_bounds = array<i64: 64, 100>}, {pipeline_mode = #tpu.pipeline_mode<synchronous>, transform_indices = @transform_30, window_bounds = array<i64: 1, 100>}, {pipeline_mode = #tpu.pipeline_mode<synchronous>, transform_indices = @transform_31, window_bounds = array<i64: 100, 100>}, {pipeline_mode = #tpu.pipeline_mode<synchronous>, transform_indices = @transform_32, window_bounds = array<i64: 1, 100>}, {pipeline_mode = #tpu.pipeline_mode<synchronous>, transform_indices = @transform_33, window_bounds = array<i64: 1, 100>}, {pipeline_mode = #tpu.pipeline_mode<synchronous>, transform_indices = @transform_34, window_bounds = array<i64: 1, 1>}, {transform_indices = @transform_35, window_bounds = array<i64: 8, 1>}]} {
    %c0 = arith.constant 0 : index
    %c0_0 = arith.constant 0 : index
    %0 = vector.load %arg31[%c0, %c0_0] : memref<1x100xf32, #tpu.memory_space<vmem>>, vector<1x100xf32>
    %1 = vector.shape_cast %0 : vector<1x100xf32> to vector<1x100xf32>
    %2 = vector.broadcast %1 : vector<1x100xf32> to vector<8x100xf32>
    %c0_1 = arith.constant 0 : index
    %c0_2 = arith.constant 0 : index
    %3 = vector.load %arg1[%c0_1, %c0_2] : memref<8x64xbf16, #tpu.memory_space<vmem>>, vector<8x64xbf16>
    %c0_3 = arith.constant 0 : index
    %c0_4 = arith.constant 0 : index
    %4 = vector.load %arg6[%c0_3, %c0_4] : memref<64x128xbf16, #tpu.memory_space<vmem>>, vector<64x128xbf16>
    %cst = arith.constant dense<0.000000e+00> : vector<8x128xf32>
    %5 = tpu.matmul %3, %4, %cst {dimension_numbers = #tpu.dot_dimension_numbers<[1], [0], [0], [1], [0, 0, 1, 1], [], []>} : vector<8x64xbf16>, vector<64x128xbf16>, vector<8x128xf32> -> vector<8x128xf32>
    %c0_5 = arith.constant 0 : index
    %c0_6 = arith.constant 0 : index
    %6 = vector.load %arg7[%c0_5, %c0_6] : memref<1x128xf32, #tpu.memory_space<vmem>>, vector<1x128xf32>
    %7 = vector.broadcast %6 : vector<1x128xf32> to vector<8x128xf32>
    %8 = arith.addf %5, %7 : vector<8x128xf32>
    %cst_7 = arith.constant 0.000000e+00 : f32
    %9 = vector.broadcast %cst_7 : f32 to vector<8x128xf32>
    %10 = arith.maximumf %8, %9 : vector<8x128xf32>
    %11 = arith.truncf %10 : vector<8x128xf32> to vector<8x128xbf16>
    %c0_8 = arith.constant 0 : index
    %c0_9 = arith.constant 0 : index
    %12 = vector.load %arg8[%c0_8, %c0_9] : memref<128x64xbf16, #tpu.memory_space<vmem>>, vector<128x64xbf16>
    %cst_10 = arith.constant dense<0.000000e+00> : vector<8x64xf32>
    %13 = tpu.matmul %11, %12, %cst_10 {dimension_numbers = #tpu.dot_dimension_numbers<[1], [0], [0], [1], [0, 0, 1, 1], [], []>} : vector<8x128xbf16>, vector<128x64xbf16>, vector<8x64xf32> -> vector<8x64xf32>
    %c0_11 = arith.constant 0 : index
    %c0_12 = arith.constant 0 : index
    %14 = vector.load %arg9[%c0_11, %c0_12] : memref<1x64xf32, #tpu.memory_space<vmem>>, vector<1x64xf32>
    %15 = vector.broadcast %14 : vector<1x64xf32> to vector<8x64xf32>
    %16 = arith.addf %13, %15 : vector<8x64xf32>
    %cst_13 = arith.constant 0.000000e+00 : f32
    %17 = vector.broadcast %cst_13 : f32 to vector<8x64xf32>
    %18 = arith.maximumf %16, %17 : vector<8x64xf32>
    %19 = arith.truncf %18 : vector<8x64xf32> to vector<8x64xbf16>
    %c0_14 = arith.constant 0 : index
    %c0_15 = arith.constant 0 : index
    %20 = vector.load %arg10[%c0_14, %c0_15] : memref<64x100xbf16, #tpu.memory_space<vmem>>, vector<64x100xbf16>
    %cst_16 = arith.constant dense<0.000000e+00> : vector<8x100xf32>
    %21 = tpu.matmul %19, %20, %cst_16 {dimension_numbers = #tpu.dot_dimension_numbers<[1], [0], [0], [1], [0, 0, 1, 1], [], []>} : vector<8x64xbf16>, vector<64x100xbf16>, vector<8x100xf32> -> vector<8x100xf32>
    %22 = arith.addf %2, %21 : vector<8x100xf32>
    %c0_17 = arith.constant 0 : index
    %c0_18 = arith.constant 0 : index
    %23 = vector.load %arg2[%c0_17, %c0_18] : memref<8x96xbf16, #tpu.memory_space<vmem>>, vector<8x96xbf16>
    %c0_19 = arith.constant 0 : index
    %c0_20 = arith.constant 0 : index
    %24 = vector.load %arg11[%c0_19, %c0_20] : memref<96x128xbf16, #tpu.memory_space<vmem>>, vector<96x128xbf16>
    %cst_21 = arith.constant dense<0.000000e+00> : vector<8x128xf32>
    %25 = tpu.matmul %23, %24, %cst_21 {dimension_numbers = #tpu.dot_dimension_numbers<[1], [0], [0], [1], [0, 0, 1, 1], [], []>} : vector<8x96xbf16>, vector<96x128xbf16>, vector<8x128xf32> -> vector<8x128xf32>
    %c0_22 = arith.constant 0 : index
    %c0_23 = arith.constant 0 : index
    %26 = vector.load %arg12[%c0_22, %c0_23] : memref<1x128xf32, #tpu.memory_space<vmem>>, vector<1x128xf32>
    %27 = vector.broadcast %26 : vector<1x128xf32> to vector<8x128xf32>
    %28 = arith.addf %25, %27 : vector<8x128xf32>
    %cst_24 = arith.constant 0.000000e+00 : f32
    %29 = vector.broadcast %cst_24 : f32 to vector<8x128xf32>
    %30 = arith.maximumf %28, %29 : vector<8x128xf32>
    %31 = arith.truncf %30 : vector<8x128xf32> to vector<8x128xbf16>
    %c0_25 = arith.constant 0 : index
    %c0_26 = arith.constant 0 : index
    %32 = vector.load %arg13[%c0_25, %c0_26] : memref<128x64xbf16, #tpu.memory_space<vmem>>, vector<128x64xbf16>
    %cst_27 = arith.constant dense<0.000000e+00> : vector<8x64xf32>
    %33 = tpu.matmul %31, %32, %cst_27 {dimension_numbers = #tpu.dot_dimension_numbers<[1], [0], [0], [1], [0, 0, 1, 1], [], []>} : vector<8x128xbf16>, vector<128x64xbf16>, vector<8x64xf32> -> vector<8x64xf32>
    %c0_28 = arith.constant 0 : index
    %c0_29 = arith.constant 0 : index
    %34 = vector.load %arg14[%c0_28, %c0_29] : memref<1x64xf32, #tpu.memory_space<vmem>>, vector<1x64xf32>
    %35 = vector.broadcast %34 : vector<1x64xf32> to vector<8x64xf32>
    %36 = arith.addf %33, %35 : vector<8x64xf32>
    %cst_30 = arith.constant 0.000000e+00 : f32
    %37 = vector.broadcast %cst_30 : f32 to vector<8x64xf32>
    %38 = arith.maximumf %36, %37 : vector<8x64xf32>
    %39 = arith.truncf %38 : vector<8x64xf32> to vector<8x64xbf16>
    %c0_31 = arith.constant 0 : index
    %c0_32 = arith.constant 0 : index
    %40 = vector.load %arg15[%c0_31, %c0_32] : memref<64x100xbf16, #tpu.memory_space<vmem>>, vector<64x100xbf16>
    %cst_33 = arith.constant dense<0.000000e+00> : vector<8x100xf32>
    %41 = tpu.matmul %39, %40, %cst_33 {dimension_numbers = #tpu.dot_dimension_numbers<[1], [0], [0], [1], [0, 0, 1, 1], [], []>} : vector<8x64xbf16>, vector<64x100xbf16>, vector<8x100xf32> -> vector<8x100xf32>
    %42 = arith.addf %22, %41 : vector<8x100xf32>
    %c0_34 = arith.constant 0 : index
    %c0_35 = arith.constant 0 : index
    %43 = vector.load %arg3[%c0_34, %c0_35] : memref<8x64xbf16, #tpu.memory_space<vmem>>, vector<8x64xbf16>
    %c0_36 = arith.constant 0 : index
    %c0_37 = arith.constant 0 : index
    %44 = vector.load %arg16[%c0_36, %c0_37] : memref<64x128xbf16, #tpu.memory_space<vmem>>, vector<64x128xbf16>
    %cst_38 = arith.constant dense<0.000000e+00> : vector<8x128xf32>
    %45 = tpu.matmul %43, %44, %cst_38 {dimension_numbers = #tpu.dot_dimension_numbers<[1], [0], [0], [1], [0, 0, 1, 1], [], []>} : vector<8x64xbf16>, vector<64x128xbf16>, vector<8x128xf32> -> vector<8x128xf32>
    %c0_39 = arith.constant 0 : index
    %c0_40 = arith.constant 0 : index
    %46 = vector.load %arg17[%c0_39, %c0_40] : memref<1x128xf32, #tpu.memory_space<vmem>>, vector<1x128xf32>
    %47 = vector.broadcast %46 : vector<1x128xf32> to vector<8x128xf32>
    %48 = arith.addf %45, %47 : vector<8x128xf32>
    %cst_41 = arith.constant 0.000000e+00 : f32
    %49 = vector.broadcast %cst_41 : f32 to vector<8x128xf32>
    %50 = arith.maximumf %48, %49 : vector<8x128xf32>
    %51 = arith.truncf %50 : vector<8x128xf32> to vector<8x128xbf16>
    %c0_42 = arith.constant 0 : index
    %c0_43 = arith.constant 0 : index
    %52 = vector.load %arg18[%c0_42, %c0_43] : memref<128x64xbf16, #tpu.memory_space<vmem>>, vector<128x64xbf16>
    %cst_44 = arith.constant dense<0.000000e+00> : vector<8x64xf32>
    %53 = tpu.matmul %51, %52, %cst_44 {dimension_numbers = #tpu.dot_dimension_numbers<[1], [0], [0], [1], [0, 0, 1, 1], [], []>} : vector<8x128xbf16>, vector<128x64xbf16>, vector<8x64xf32> -> vector<8x64xf32>
    %c0_45 = arith.constant 0 : index
    %c0_46 = arith.constant 0 : index
    %54 = vector.load %arg19[%c0_45, %c0_46] : memref<1x64xf32, #tpu.memory_space<vmem>>, vector<1x64xf32>
    %55 = vector.broadcast %54 : vector<1x64xf32> to vector<8x64xf32>
    %56 = arith.addf %53, %55 : vector<8x64xf32>
    %cst_47 = arith.constant 0.000000e+00 : f32
    %57 = vector.broadcast %cst_47 : f32 to vector<8x64xf32>
    %58 = arith.maximumf %56, %57 : vector<8x64xf32>
    %59 = arith.truncf %58 : vector<8x64xf32> to vector<8x64xbf16>
    %c0_48 = arith.constant 0 : index
    %c0_49 = arith.constant 0 : index
    %60 = vector.load %arg20[%c0_48, %c0_49] : memref<64x100xbf16, #tpu.memory_space<vmem>>, vector<64x100xbf16>
    %cst_50 = arith.constant dense<0.000000e+00> : vector<8x100xf32>
    %61 = tpu.matmul %59, %60, %cst_50 {dimension_numbers = #tpu.dot_dimension_numbers<[1], [0], [0], [1], [0, 0, 1, 1], [], []>} : vector<8x64xbf16>, vector<64x100xbf16>, vector<8x100xf32> -> vector<8x100xf32>
    %62 = arith.addf %42, %61 : vector<8x100xf32>
    %c0_51 = arith.constant 0 : index
    %c0_52 = arith.constant 0 : index
    %63 = vector.load %arg4[%c0_51, %c0_52] : memref<8x48xbf16, #tpu.memory_space<vmem>>, vector<8x48xbf16>
    %c0_53 = arith.constant 0 : index
    %c0_54 = arith.constant 0 : index
    %64 = vector.load %arg21[%c0_53, %c0_54] : memref<48x128xbf16, #tpu.memory_space<vmem>>, vector<48x128xbf16>
    %cst_55 = arith.constant dense<0.000000e+00> : vector<8x128xf32>
    %65 = tpu.matmul %63, %64, %cst_55 {dimension_numbers = #tpu.dot_dimension_numbers<[1], [0], [0], [1], [0, 0, 1, 1], [], []>} : vector<8x48xbf16>, vector<48x128xbf16>, vector<8x128xf32> -> vector<8x128xf32>
    %c0_56 = arith.constant 0 : index
    %c0_57 = arith.constant 0 : index
    %66 = vector.load %arg22[%c0_56, %c0_57] : memref<1x128xf32, #tpu.memory_space<vmem>>, vector<1x128xf32>
    %67 = vector.broadcast %66 : vector<1x128xf32> to vector<8x128xf32>
    %68 = arith.addf %65, %67 : vector<8x128xf32>
    %cst_58 = arith.constant 0.000000e+00 : f32
    %69 = vector.broadcast %cst_58 : f32 to vector<8x128xf32>
    %70 = arith.maximumf %68, %69 : vector<8x128xf32>
    %71 = arith.truncf %70 : vector<8x128xf32> to vector<8x128xbf16>
    %c0_59 = arith.constant 0 : index
    %c0_60 = arith.constant 0 : index
    %72 = vector.load %arg23[%c0_59, %c0_60] : memref<128x64xbf16, #tpu.memory_space<vmem>>, vector<128x64xbf16>
    %cst_61 = arith.constant dense<0.000000e+00> : vector<8x64xf32>
    %73 = tpu.matmul %71, %72, %cst_61 {dimension_numbers = #tpu.dot_dimension_numbers<[1], [0], [0], [1], [0, 0, 1, 1], [], []>} : vector<8x128xbf16>, vector<128x64xbf16>, vector<8x64xf32> -> vector<8x64xf32>
    %c0_62 = arith.constant 0 : index
    %c0_63 = arith.constant 0 : index
    %74 = vector.load %arg24[%c0_62, %c0_63] : memref<1x64xf32, #tpu.memory_space<vmem>>, vector<1x64xf32>
    %75 = vector.broadcast %74 : vector<1x64xf32> to vector<8x64xf32>
    %76 = arith.addf %73, %75 : vector<8x64xf32>
    %cst_64 = arith.constant 0.000000e+00 : f32
    %77 = vector.broadcast %cst_64 : f32 to vector<8x64xf32>
    %78 = arith.maximumf %76, %77 : vector<8x64xf32>
    %79 = arith.truncf %78 : vector<8x64xf32> to vector<8x64xbf16>
    %c0_65 = arith.constant 0 : index
    %c0_66 = arith.constant 0 : index
    %80 = vector.load %arg25[%c0_65, %c0_66] : memref<64x100xbf16, #tpu.memory_space<vmem>>, vector<64x100xbf16>
    %cst_67 = arith.constant dense<0.000000e+00> : vector<8x100xf32>
    %81 = tpu.matmul %79, %80, %cst_67 {dimension_numbers = #tpu.dot_dimension_numbers<[1], [0], [0], [1], [0, 0, 1, 1], [], []>} : vector<8x64xbf16>, vector<64x100xbf16>, vector<8x100xf32> -> vector<8x100xf32>
    %82 = arith.addf %62, %81 : vector<8x100xf32>
    %c0_68 = arith.constant 0 : index
    %c0_69 = arith.constant 0 : index
    %83 = vector.load %arg5[%c0_68, %c0_69] : memref<8x80xbf16, #tpu.memory_space<vmem>>, vector<8x80xbf16>
    %c0_70 = arith.constant 0 : index
    %c0_71 = arith.constant 0 : index
    %84 = vector.load %arg26[%c0_70, %c0_71] : memref<80x128xbf16, #tpu.memory_space<vmem>>, vector<80x128xbf16>
    %cst_72 = arith.constant dense<0.000000e+00> : vector<8x128xf32>
    %85 = tpu.matmul %83, %84, %cst_72 {dimension_numbers = #tpu.dot_dimension_numbers<[1], [0], [0], [1], [0, 0, 1, 1], [], []>} : vector<8x80xbf16>, vector<80x128xbf16>, vector<8x128xf32> -> vector<8x128xf32>
    %c0_73 = arith.constant 0 : index
    %c0_74 = arith.constant 0 : index
    %86 = vector.load %arg27[%c0_73, %c0_74] : memref<1x128xf32, #tpu.memory_space<vmem>>, vector<1x128xf32>
    %87 = vector.broadcast %86 : vector<1x128xf32> to vector<8x128xf32>
    %88 = arith.addf %85, %87 : vector<8x128xf32>
    %cst_75 = arith.constant 0.000000e+00 : f32
    %89 = vector.broadcast %cst_75 : f32 to vector<8x128xf32>
    %90 = arith.maximumf %88, %89 : vector<8x128xf32>
    %91 = arith.truncf %90 : vector<8x128xf32> to vector<8x128xbf16>
    %c0_76 = arith.constant 0 : index
    %c0_77 = arith.constant 0 : index
    %92 = vector.load %arg28[%c0_76, %c0_77] : memref<128x64xbf16, #tpu.memory_space<vmem>>, vector<128x64xbf16>
    %cst_78 = arith.constant dense<0.000000e+00> : vector<8x64xf32>
    %93 = tpu.matmul %91, %92, %cst_78 {dimension_numbers = #tpu.dot_dimension_numbers<[1], [0], [0], [1], [0, 0, 1, 1], [], []>} : vector<8x128xbf16>, vector<128x64xbf16>, vector<8x64xf32> -> vector<8x64xf32>
    %c0_79 = arith.constant 0 : index
    %c0_80 = arith.constant 0 : index
    %94 = vector.load %arg29[%c0_79, %c0_80] : memref<1x64xf32, #tpu.memory_space<vmem>>, vector<1x64xf32>
    %95 = vector.broadcast %94 : vector<1x64xf32> to vector<8x64xf32>
    %96 = arith.addf %93, %95 : vector<8x64xf32>
    %cst_81 = arith.constant 0.000000e+00 : f32
    %97 = vector.broadcast %cst_81 : f32 to vector<8x64xf32>
    %98 = arith.maximumf %96, %97 : vector<8x64xf32>
    %99 = arith.truncf %98 : vector<8x64xf32> to vector<8x64xbf16>
    %c0_82 = arith.constant 0 : index
    %c0_83 = arith.constant 0 : index
    %100 = vector.load %arg30[%c0_82, %c0_83] : memref<64x100xbf16, #tpu.memory_space<vmem>>, vector<64x100xbf16>
    %cst_84 = arith.constant dense<0.000000e+00> : vector<8x100xf32>
    %101 = tpu.matmul %99, %100, %cst_84 {dimension_numbers = #tpu.dot_dimension_numbers<[1], [0], [0], [1], [0, 0, 1, 1], [], []>} : vector<8x64xbf16>, vector<64x100xbf16>, vector<8x100xf32> -> vector<8x100xf32>
    %102 = arith.addf %82, %101 : vector<8x100xf32>
    %cst_85 = arith.constant 0.000000e+00 : f32
    %103 = vector.broadcast %cst_85 : f32 to vector<8x100xf32>
    %104 = arith.maximumf %102, %103 : vector<8x100xf32>
    %105 = arith.truncf %104 : vector<8x100xf32> to vector<8x100xbf16>
    %c0_86 = arith.constant 0 : index
    %c0_87 = arith.constant 0 : index
    %106 = vector.load %arg32[%c0_86, %c0_87] : memref<100x100xbf16, #tpu.memory_space<vmem>>, vector<100x100xbf16>
    %cst_88 = arith.constant dense<0.000000e+00> : vector<8x100xf32>
    %107 = tpu.matmul %105, %106, %cst_88 {dimension_numbers = #tpu.dot_dimension_numbers<[1], [0], [0], [1], [0, 0, 1, 1], [], []>} : vector<8x100xbf16>, vector<100x100xbf16>, vector<8x100xf32> -> vector<8x100xf32>
    %c0_89 = arith.constant 0 : index
    %c0_90 = arith.constant 0 : index
    %108 = vector.load %arg33[%c0_89, %c0_90] : memref<1x100xf32, #tpu.memory_space<vmem>>, vector<1x100xf32>
    %109 = vector.broadcast %108 : vector<1x100xf32> to vector<8x100xf32>
    %110 = arith.addf %107, %109 : vector<8x100xf32>
    %cst_91 = arith.constant 0.000000e+00 : f32
    %111 = vector.broadcast %cst_91 : f32 to vector<8x100xf32>
    %112 = arith.maximumf %110, %111 : vector<8x100xf32>
    %c0_92 = arith.constant 0 : index
    %c0_93 = arith.constant 0 : index
    %113 = vector.load %arg34[%c0_92, %c0_93] : memref<1x100xf32, #tpu.memory_space<vmem>>, vector<1x100xf32>
    %114 = vector.broadcast %113 : vector<1x100xf32> to vector<8x100xf32>
    %115 = arith.mulf %112, %114 : vector<8x100xf32>
    %cst_94 = arith.constant dense<0.000000e+00> : vector<8xf32>
    %116 = vector.multi_reduction <add>, %115, %cst_94 [1] : vector<8x100xf32> to vector<8xf32>
    %117 = vector.shape_cast %116 : vector<8xf32> to vector<8x1xf32>
    %c0_95 = arith.constant 0 : index
    %c0_96 = arith.constant 0 : index
    %118 = vector.load %arg35[%c0_95, %c0_96] : memref<1x1xf32, #tpu.memory_space<vmem>>, vector<1x1xf32>
    %119 = vector.broadcast %118 : vector<1x1xf32> to vector<8x1xf32>
    %120 = arith.addf %117, %119 : vector<8x1xf32>
    %c0_97 = arith.constant 0 : index
    %c0_98 = arith.constant 0 : index
    %121 = vector.load %arg36[%c0_97, %c0_98] : memref<8x1xf32, #tpu.memory_space<vmem>>, vector<8x1xf32>
    tpu.vector_store %arg36[%c0_97, %c0_98], %120 {strides = array<i32>} : memref<8x1xf32, #tpu.memory_space<vmem>>, vector<8x1xf32>,
    return
  }
  func.func @transform_0(%arg0: i32) -> (i32, i32) {
    %c0_i32 = arith.constant 0 : i32
    %c0_i32_0 = arith.constant 0 : i32
    return %arg0, %c0_i32 : i32, i32
  }
  func.func @transform_1(%arg0: i32) -> (i32, i32) {
    %c0_i32 = arith.constant 0 : i32
    %c0_i32_0 = arith.constant 0 : i32
    return %arg0, %c0_i32 : i32, i32
  }
  func.func @transform_2(%arg0: i32) -> (i32, i32) {
    %c0_i32 = arith.constant 0 : i32
    %c0_i32_0 = arith.constant 0 : i32
    return %arg0, %c0_i32 : i32, i32
  }
  func.func @transform_3(%arg0: i32) -> (i32, i32) {
    %c0_i32 = arith.constant 0 : i32
    %c0_i32_0 = arith.constant 0 : i32
    return %arg0, %c0_i32 : i32, i32
  }
  func.func @transform_4(%arg0: i32) -> (i32, i32) {
    %c0_i32 = arith.constant 0 : i32
    %c0_i32_0 = arith.constant 0 : i32
    return %arg0, %c0_i32 : i32, i32
  }
  func.func @transform_5(%arg0: i32) -> (i32, i32) {
    %c0_i32 = arith.constant 0 : i32
    %c0_i32_0 = arith.constant 0 : i32
    %c0_i32_1 = arith.constant 0 : i32
    return %c0_i32, %c0_i32_0 : i32, i32
  }
  func.func @transform_6(%arg0: i32) -> (i32, i32) {
    %c0_i32 = arith.constant 0 : i32
    %c0_i32_0 = arith.constant 0 : i32
    %c0_i32_1 = arith.constant 0 : i32
    return %c0_i32, %c0_i32_0 : i32, i32
  }
  func.func @transform_7(%arg0: i32) -> (i32, i32) {
    %c0_i32 = arith.constant 0 : i32
    %c0_i32_0 = arith.constant 0 : i32
    %c0_i32_1 = arith.constant 0 : i32
    return %c0_i32, %c0_i32_0 : i32, i32
  }
  func.func @transform_8(%arg0: i32) -> (i32, i32) {
    %c0_i32 = arith.constant 0 : i32
    %c0_i32_0 = arith.constant 0 : i32
    %c0_i32_1 = arith.constant 0 : i32
    return %c0_i32, %c0_i32_0 : i32, i32
  }
  func.func @transform_9(%arg0: i32) -> (i32, i32) {
    %c0_i32 = arith.constant 0 : i32
    %c0_i32_0 = arith.constant 0 : i32
    %c0_i32_1 = arith.constant 0 : i32
    return %c0_i32, %c0_i32_0 : i32, i32
  }
  func.func @transform_10(%arg0: i32) -> (i32, i32) {
    %c0_i32 = arith.constant 0 : i32
    %c0_i32_0 = arith.constant 0 : i32
    %c0_i32_1 = arith.constant 0 : i32
    return %c0_i32, %c0_i32_0 : i32, i32
  }
  func.func @transform_11(%arg0: i32) -> (i32, i32) {
    %c0_i32 = arith.constant 0 : i32
    %c0_i32_0 = arith.constant 0 : i32
    %c0_i32_1 = arith.constant 0 : i32
    return %c0_i32, %c0_i32_0 : i32, i32
  }
  func.func @transform_12(%arg0: i32) -> (i32, i32) {
    %c0_i32 = arith.constant 0 : i32
    %c0_i32_0 = arith.constant 0 : i32
    %c0_i32_1 = arith.constant 0 : i32
    return %c0_i32, %c0_i32_0 : i32, i32
  }
  func.func @transform_13(%arg0: i32) -> (i32, i32) {
    %c0_i32 = arith.constant 0 : i32
    %c0_i32_0 = arith.constant 0 : i32
    %c0_i32_1 = arith.constant 0 : i32
    return %c0_i32, %c0_i32_0 : i32, i32
  }
  func.func @transform_14(%arg0: i32) -> (i32, i32) {
    %c0_i32 = arith.constant 0 : i32
    %c0_i32_0 = arith.constant 0 : i32
    %c0_i32_1 = arith.constant 0 : i32
    return %c0_i32, %c0_i32_0 : i32, i32
  }
  func.func @transform_15(%arg0: i32) -> (i32, i32) {
    %c0_i32 = arith.constant 0 : i32
    %c0_i32_0 = arith.constant 0 : i32
    %c0_i32_1 = arith.constant 0 : i32
    return %c0_i32, %c0_i32_0 : i32, i32
  }
  func.func @transform_16(%arg0: i32) -> (i32, i32) {
    %c0_i32 = arith.constant 0 : i32
    %c0_i32_0 = arith.constant 0 : i32
    %c0_i32_1 = arith.constant 0 : i32
    return %c0_i32, %c0_i32_0 : i32, i32
  }
  func.func @transform_17(%arg0: i32) -> (i32, i32) {
    %c0_i32 = arith.constant 0 : i32
    %c0_i32_0 = arith.constant 0 : i32
    %c0_i32_1 = arith.constant 0 : i32
    return %c0_i32, %c0_i32_0 : i32, i32
  }
  func.func @transform_18(%arg0: i32) -> (i32, i32) {
    %c0_i32 = arith.constant 0 : i32
    %c0_i32_0 = arith.constant 0 : i32
    %c0_i32_1 = arith.constant 0 : i32
    return %c0_i32, %c0_i32_0 : i32, i32
  }
  func.func @transform_19(%arg0: i32) -> (i32, i32) {
    %c0_i32 = arith.constant 0 : i32
    %c0_i32_0 = arith.constant 0 : i32
    %c0_i32_1 = arith.constant 0 : i32
    return %c0_i32, %c0_i32_0 : i32, i32
  }
  func.func @transform_20(%arg0: i32) -> (i32, i32) {
    %c0_i32 = arith.constant 0 : i32
    %c0_i32_0 = arith.constant 0 : i32
    %c0_i32_1 = arith.constant 0 : i32
    return %c0_i32, %c0_i32_0 : i32, i32
  }
  func.func @transform_21(%arg0: i32) -> (i32, i32) {
    %c0_i32 = arith.constant 0 : i32
    %c0_i32_0 = arith.constant 0 : i32
    %c0_i32_1 = arith.constant 0 : i32
    return %c0_i32, %c0_i32_0 : i32, i32
  }
  func.func @transform_22(%arg0: i32) -> (i32, i32) {
    %c0_i32 = arith.constant 0 : i32
    %c0_i32_0 = arith.constant 0 : i32
    %c0_i32_1 = arith.constant 0 : i32
    return %c0_i32, %c0_i32_0 : i32, i32
  }
  func.func @transform_23(%arg0: i32) -> (i32, i32) {
    %c0_i32 = arith.constant 0 : i32
    %c0_i32_0 = arith.constant 0 : i32
    %c0_i32_1 = arith.constant 0 : i32
    return %c0_i32, %c0_i32_0 : i32, i32
  }
  func.func @transform_24(%arg0: i32) -> (i32, i32) {
    %c0_i32 = arith.constant 0 : i32
    %c0_i32_0 = arith.constant 0 : i32
    %c0_i32_1 = arith.constant 0 : i32
    return %c0_i32, %c0_i32_0 : i32, i32
  }
  func.func @transform_25(%arg0: i32) -> (i32, i32) {
    %c0_i32 = arith.constant 0 : i32
    %c0_i32_0 = arith.constant 0 : i32
    %c0_i32_1 = arith.constant 0 : i32
    return %c0_i32, %c0_i32_0 : i32, i32
  }
  func.func @transform_26(%arg0: i32) -> (i32, i32) {
    %c0_i32 = arith.constant 0 : i32
    %c0_i32_0 = arith.constant 0 : i32
    %c0_i32_1 = arith.constant 0 : i32
    return %c0_i32, %c0_i32_0 : i32, i32
  }
  func.func @transform_27(%arg0: i32) -> (i32, i32) {
    %c0_i32 = arith.constant 0 : i32
    %c0_i32_0 = arith.constant 0 : i32
    %c0_i32_1 = arith.constant 0 : i32
    return %c0_i32, %c0_i32_0 : i32, i32
  }
  func.func @transform_28(%arg0: i32) -> (i32, i32) {
    %c0_i32 = arith.constant 0 : i32
    %c0_i32_0 = arith.constant 0 : i32
    %c0_i32_1 = arith.constant 0 : i32
    return %c0_i32, %c0_i32_0 : i32, i32
  }
  func.func @transform_29(%arg0: i32) -> (i32, i32) {
    %c0_i32 = arith.constant 0 : i32
    %c0_i32_0 = arith.constant 0 : i32
    %c0_i32_1 = arith.constant 0 : i32
    return %c0_i32, %c0_i32_0 : i32, i32
  }
  func.func @transform_30(%arg0: i32) -> (i32, i32) {
    %c0_i32 = arith.constant 0 : i32
    %c0_i32_0 = arith.constant 0 : i32
    %c0_i32_1 = arith.constant 0 : i32
    return %c0_i32, %c0_i32_0 : i32, i32
  }
  func.func @transform_31(%arg0: i32) -> (i32, i32) {
    %c0_i32 = arith.constant 0 : i32
    %c0_i32_0 = arith.constant 0 : i32
    %c0_i32_1 = arith.constant 0 : i32
    return %c0_i32, %c0_i32_0 : i32, i32
  }
  func.func @transform_32(%arg0: i32) -> (i32, i32) {
    %c0_i32 = arith.constant 0 : i32
    %c0_i32_0 = arith.constant 0 : i32
    %c0_i32_1 = arith.constant 0 : i32
    return %c0_i32, %c0_i32_0 : i32, i32
  }
  func.func @transform_33(%arg0: i32) -> (i32, i32) {
    %c0_i32 = arith.constant 0 : i32
    %c0_i32_0 = arith.constant 0 : i32
    %c0_i32_1 = arith.constant 0 : i32
    return %c0_i32, %c0_i32_0 : i32, i32
  }
  func.func @transform_34(%arg0: i32) -> (i32, i32) {
    %c0_i32 = arith.constant 0 : i32
    %c0_i32_0 = arith.constant 0 : i32
    %c0_i32_1 = arith.constant 0 : i32
    return %c0_i32, %c0_i32_0 : i32, i32
  }
  func.func @transform_35(%arg0: i32) -> (i32, i32) {
    %c0_i32 = arith.constant 0 : i32
    %c0_i32_0 = arith.constant 0 : i32
    return %arg0, %c0_i32 : i32, i32
  }
}

</mosaic_0001>

<bundles_post_ra>
// kernel: vae_deepdep_forward.1
= control target key start
LH: loop header
LB: loop body
LE: loop exit
PB: predicated region body
PF: predicated region fallthrough
CT: control target
= control target key end

     0   :  { %s1742_s3 = smov 5   ;;  %s1743_s7 = smov 10   ;;  %vm190_vm0 = vcmask 523264   ;;  %vm394_vm1 = vcmask 785408   ;;  %vm761_vm2 = vcmask 392192   ;;  %vm957_vm3 = vcmask 654336   ;;  %s2006_s0 = inlined_call_operand.smem [shape: u32[36], index: -1, kind: input, shape index: {}] }
   0x1   :  { %s1211_s6 = sld [smem:[%s2006_s0 + %s1742_s3]]   ;;  %s1744_s11 = smov 7   ;;  %vm1170_vm4 = vcmask 1041408   ;;  %vm1166_vm5 = vcmask 818176   ;;  %vm1201_vm6 = vcmask 7168  }
   0x2   :  { %s1788_s10 = sld [smem:[%s2006_s0 + %s1743_s7]]   ;;  %s1745_s15 = smov 6  }
   0x3   :  { %s1793_s14 = sld [smem:[%s2006_s0 + %s1744_s11]]   ;;  %s1746_s19 = smov 12  }
   0x4   :  { %s1799_s18 = sld [smem:[%s2006_s0 + %s1745_s15]]   ;;  %s1747_s26 = smov 1  }
   0x5   :  { %s1805_s22 = sld [smem:[%s2006_s0 + %s1746_s19]]   ;;  %s1748_s30 = smov 11  }
   0x6   :  { %s1_s25 = sld [smem:[%s2006_s0]]   ;;  %s1749_s4 = smov 8  }
   0x7   :  { %v1608_v0 = vld [vmem:[%s1211_s6 + $0x18] sm:$0xff]  ;;  %v1607_v2 = vld [vmem:[%s1211_s6 + $0x10] sm:$0xff]  ;;  %v1606_v5 = vld [vmem:[%s1211_s6 + $0x8] sm:$0xff]  ;;  %s1207_s29 = sld [smem:[%s2006_s0 + %s1747_s26]]   ;;  %s1750_s8 = smov 15  }
   0x8   :  { %v1626_v1 = vld [vmem:[%s1788_s10 + $0x28] sm:$0xff]  ;;  %198 = vmatpush.bf16.msra.mxu0 %v1608_v0  ;;  %v1625_v3 = vld [vmem:[%s1788_s10 + $0x20] sm:$0xff]  ;;  %v1624_v7 = vld [vmem:[%s1788_s10 + $0x18] sm:$0xff]  ;;  %s1830_s3 = sld [smem:[%s2006_s0 + %s1748_s30]]   ;;  %s1751_s12 = smov 20  }
   0x9   :  { %400 = vmatpush.bf16.msra.mxu3 %v1626_v1  ;;  %v1616_v4 = vld [vmem:[%s1793_s14 + $0x38] sm:$0xff]  ;;  %v1615_v6 = vld [vmem:[%s1793_s14 + $0x30] sm:$0xff]  ;;  %v1605_v8 = vld [vmem:[%s1211_s6] sm:$0xff]  ;;  %s1835_s7 = sld [smem:[%s2006_s0 + %s1749_s4]]   ;;  %s1753_s21 = smov 3  }
   0xa   :  { %277 = vmatpush.bf16.msra.mxu1 %v1616_v4  ;;  %v1614_v9 = vld [vmem:[%s1793_s14 + $0x28] sm:$0xff]  ;;  %v1623_v10 = vld [vmem:[%s1788_s10 + $0x10] sm:$0xff]  ;;  %v1613_v13 = vld [vmem:[%s1793_s14 + $0x20] sm:$0xff]  ;;  %s1221_s11 = sld [smem:[%s2006_s0 + %s1750_s8]]   ;;  %s1756_s2 = smov 13  }
   0xb   :  { %v1634_v11 = vld [vmem:[%s1805_s22 + $0x38] sm:$0xff]  ;;  %v1622_v14 = vld [vmem:[%s1788_s10 + $0x8] sm:$0xff]  ;;  %v1633_v15 = vld [vmem:[%s1805_s22 + $0x30] sm:$0xff]  ;;  %s1226_s16 = sld [smem:[%s2006_s0 + %s1751_s12]]   ;;  %s1764_s8 = smov 22  }
   0xc   :  { %199 = vmatpush.bf16.msra.mxu0 %v1607_v2  ;;  %v153_v12 = vld [vmem:[%s1_s25] sm:$0xf]  ;;  %v1612_v16 = vld [vmem:[%s1793_s14 + $0x18] sm:$0xff]  ;;  %v1632_v18 = vld [vmem:[%s1805_s22 + $0x28] sm:$0xff]  ;;  %s1209_s24 = sld [smem:[%s2006_s0 + %s1753_s21]]   ;;  %s1754_s25 = smov 9  }
   0xd   :  { %401 = vmatpush.bf16.msra.mxu3 %v1625_v3  ;;  %v1621_v17 = vld [vmem:[%s1788_s10] sm:$0xff]  ;;  %v1611_v19 = vld [vmem:[%s1793_s14 + $0x10] sm:$0xff]  ;;  %v1610_v21 = vld [vmem:[%s1793_s14 + $0x8] sm:$0xff]  ;;  %s1863_s28 = sld [smem:[%s2006_s0 + %s1754_s25]]   ;;  %s1773_s13 = smov 31  }
   0xe   :  { %278 = vmatpush.bf16.msra.mxu1 %v1615_v6  ;;  %v341_v20 = vld [vmem:[%s1207_s29] sm:$0xf]  ;;  %v1630_v24 = vld [vmem:[%s1805_s22 + $0x18] sm:$0xff]  ;;  %v1629_v25 = vld [vmem:[%s1805_s22 + $0x10] sm:$0xff]  ;;  %s1877_s6 = sld [smem:[%s2006_s0 + %s1756_s2]]   ;;  %s1763_s2 = smov 14  }
   0xf   :  { %v1631_v22 = vld [vmem:[%s1805_s22 + $0x20] sm:$0xff]  ;;  %v1628_v26 = vld [vmem:[%s1805_s22 + $0x8] sm:$0xff]  ;;  %s1775_s21 = smov 34   ;;  %s1776_s25 = smov 35  }
  0x10   :  { %200 = vmatpush.bf16.msra.mxu0 %v1606_v5  ;;  %v1609_v23 = vld [vmem:[%s1793_s14] sm:$0xff]  ;;  %v1642_v28 = vld [vmem:[%s1221_s11 + $0x18] sm:$0xff]  ;;  %s1752_s14 = smov 25   ;;  %v1641_v29 = vld [vmem:[%s1221_s11 + $0x10] sm:$0xff]  ;;  %s1241_s29 = sld [smem:[%s2006_s0 + %s1776_s25]]  }
  0x11   :  { %402 = vmatpush.bf16.msra.mxu3 %v1624_v7  ;;  %v1627_v27 = vld [vmem:[%s1805_s22] sm:$0xff]  ;;  %s1853_s20 = sld [smem:[%s2006_s0 + %s1752_s14]]   ;;  %v1657_v30 = vld [vmem:[%s1226_s16 + $0x10] sm:$0xff]  ;;  %v1656_v31 = vld [vmem:[%s1226_s16 + $0x8] sm:$0xff]  ;;  %s1768_s22 = smov 28  }
  0x12   :  { %279 = vmatpush.bf16.msra.mxu1 %v1614_v9  ;;  %v1640_v32 = vld [vmem:[%s1221_s11 + $0x8] sm:$0xff]  ;;  %v1728_v33 = vld [vmem:[%s1799_s18] ss:$0 sm:$0xff]  ;;  %s1755_s18 = smov 4   ;;  %s1968_s26 = sld [smem:[%s2006_s0 + %s1768_s22]]  }
  0x13   :  { %v1655_v34 = vld [vmem:[%s1226_s16] sm:$0xff]  ;;  %v1620_v44 = vld [vmem:[%s1863_s28 + $0x18] sm:$0xff]  ;;  %v1619_v46 = vld [vmem:[%s1863_s28 + $0x10] sm:$0xff]  ;;  %s1210_s1 = sld [smem:[%s2006_s0 + %s1755_s18]]   ;;  %s1759_s16 = smov 21  }
  0x14   :  { %201 = vmatpush.bf16.msra.mxu0 %v1605_v8  ;;  %v1639_v36 = vld [vmem:[%s1221_s11] sm:$0xff]  ;;  %331 = vmatpush.bf16.msra.mxu2 %v1620_v44  ;;  %s1758_s11 = smov 16   ;;  %s1891_s19 = sld [smem:[%s2006_s0 + %s1759_s16]]   ;;  %v1618_v57 = vld [vmem:[%s1863_s28 + $0x8] sm:$0xff] }
  0x15   :  { %403 = vmatpush.bf16.msra.mxu3 %v1623_v10  ;;  %v732_v41 = vld [vmem:[%s1209_s24] sm:$0xf]  ;;  %s1886_s15 = sld [smem:[%s2006_s0 + %s1758_s11]]   ;;  %s1761_s24 = smov 30  }
  0x16   :  { %280 = vmatpush.bf16.msra.mxu1 %v1613_v13  ;;  %v1729_v47 = vld [vmem:[%s1830_s3] ss:$0 sm:$0xff]  ;;  %s1757_s3 = smov 2   ;;  %s1902_s27 = sld [smem:[%s2006_s0 + %s1761_s24]]  }
  0x17   :  { %1258 = vmatmul.msk.bf16.vlgmr.msra.gmra.mxu0 %vm190_vm0, %v153_v12  ;;  %v1674_v35 = vld [vmem:[%s1853_s20 + $0x20] sm:$0xff]  ;;  %v1673_v42 = vld [vmem:[%s1853_s20 + $0x18] sm:$0xff]  ;;  %v1672_v43 = vld [vmem:[%s1853_s20 + $0x10] sm:$0xff]  ;;  %s1208_s10 = sld [smem:[%s2006_s0 + %s1757_s3]]   ;;  %s1762_s18 = smov 17  }
  0x18   :  { %481 = vmatpush.bf16.msrb.mxu0 %v1634_v11  ;;  %v1671_v48 = vld [vmem:[%s1853_s20 + $0x8] sm:$0xff]  ;;  %332 = vmatpush.bf16.msra.mxu2 %v1619_v46  ;;  %v1670_v51 = vld [vmem:[%s1853_s20] sm:$0xff]  ;;  %s1760_s20 = smov 26   ;;  %s1220_s3 = sld [smem:[%s2006_s0 + %s1763_s2]]  }
  0x19   :  { %404 = vmatpush.bf16.msra.mxu3 %v1622_v14  ;;  %v912_v54 = vld [vmem:[%s1210_s1] sm:$0xf]  ;;  %s1897_s23 = sld [smem:[%s2006_s0 + %s1760_s20]]   ;;  %s1774_s14 = smov 33  }
  0x1a   :  { %281 = vmatpush.bf16.msra.mxu1 %v1612_v16  ;;  %s1907_s1 = sld [smem:[%s2006_s0 + %s1762_s18]]   ;;  %v1617_v59 = vld [vmem:[%s1863_s28] sm:$0xff]  ;;  %s1765_s28 = smov 27  }
  0x1b   :  { %s1919_s11 = sld [smem:[%s2006_s0 + %s1764_s8]]   ;;  %v1730_v11 = vld [vmem:[%s1835_s7] ss:$0 sm:$0xff]  ;;  %s1766_s7 = smov 18  }
  0x1c   :  { %482 = vmatpush.bf16.msrb.mxu0 %v1633_v15  ;;  %333 = vmatpush.bf16.msra.mxu2 %v1618_v57  ;;  %s1931_s16 = sld [smem:[%s2006_s0 + %s1765_s28]]   ;;  %s1769_s18 = smov 19  }
  0x1d   :  { %405 = vmatpush.bf16.msra.mxu3 %v1621_v17  ;;  %v545_v56 = vld [vmem:[%s1208_s10] sm:$0xf]  ;;  %s1957_s17 = sld [smem:[%s2006_s0 + %s1766_s7]]  }
  0x1e   :  { %282 = vmatpush.bf16.msra.mxu1 %v1611_v19  ;;  %v1638_v61 = vld [vmem:[%s1220_s3 + $0x18] sm:$0xff]  ;;  %v1637_v63 = vld [vmem:[%s1220_s3 + $0x10] sm:$0xff]  ;;  %v1636_v2 = vld [vmem:[%s1220_s3 + $0x8] sm:$0xff]  ;;  %s1225_s30 = sld [smem:[%s2006_s0 + %s1769_s18]]  }
  0x1f   :  { %v1635_v5 = vld [vmem:[%s1220_s3] sm:$0xff]  ;;  %s1771_s3 = smov 29   ;;  %s1239_s20 = sld [smem:[%s2006_s0 + %s1774_s14]]  }
  0x20   :  { %483 = vmatpush.bf16.msrb.mxu0 %v1632_v18  ;;  %1332 = vmatmul.msk.bf16.vlgmr.msra.gmra.mxu3 %vm394_vm1, %v341_v20  ;;  %v1650_v58 = vld [vmem:[%s1907_s1 + $0x38] sm:$0xff]  ;;  %v1649_v60 = vld [vmem:[%s1907_s1 + $0x30] sm:$0xff]  ;;  %v1648_v62 = vld [vmem:[%s1907_s1 + $0x28] sm:$0xff]  ;;  %s1235_s10 = sld [smem:[%s2006_s0 + %s1771_s3]]  }
  0x21   :  { %770 = vmatpush.bf16.msrb.mxu3 %v1657_v30  ;;  %334 = vmatpush.bf16.msra.mxu2 %v1617_v59  ;;  %v1647_v0 = vld [vmem:[%s1907_s1 + $0x20] sm:$0xff]  ;;  %v1665_v1 = vld [vmem:[%s1919_s11 + $0x38] sm:$0xff]  ;;  %v1664_v4 = vld [vmem:[%s1919_s11 + $0x30] sm:$0xff]  ;;  %s1240_s24 = sld [smem:[%s2006_s0 + %s1775_s21]]  }
  0x22   :  { %283 = vmatpush.bf16.msra.mxu1 %v1610_v21  ;;  %v1646_v3 = vld [vmem:[%s1907_s1 + $0x18] sm:$0xff]  ;;  %v1645_v6 = vld [vmem:[%s1907_s1 + $0x10] sm:$0xff]  ;;  %v1663_v7 = vld [vmem:[%s1919_s11 + $0x28] sm:$0xff] }
  0x23   :  { %v1644_v8 = vld [vmem:[%s1907_s1 + $0x8] sm:$0xff]  ;;  %v1662_v9 = vld [vmem:[%s1919_s11 + $0x20] sm:$0xff]  ;;  %v1661_v12 = vld [vmem:[%s1919_s11 + $0x18] sm:$0xff] }
  0x24   :  { %484 = vmatpush.bf16.msrb.mxu0 %v1631_v22  ;;  %v1643_v10 = vld [vmem:[%s1907_s1] sm:$0xff]  ;;  %v1682_v13 = vld [vmem:[%s1931_s16 + $0x38] sm:$0xff]  ;;  %v1660_v16 = vld [vmem:[%s1919_s11 + $0x10] sm:$0xff]  ;;  %s1770_s1 = smov 24  }
  0x25   :  { %771 = vmatpush.bf16.msrb.mxu3 %v1656_v31  ;;  %535 = vmatpush.bf16.msrb.mxu2 %v1638_v61  ;;  %v1681_v17 = vld [vmem:[%s1931_s16 + $0x30] sm:$0xff]  ;;  %v1659_v20 = vld [vmem:[%s1919_s11 + $0x8] sm:$0xff]  ;;  %v1733_v22 = vld [vmem:[%s1891_s19] ss:$0 sm:$0xff]  ;;  %s1767_s19 = smov 23   ;;  %s1230_s5 = sld [smem:[%s2006_s0 + %s1770_s1]]  }
  0x26   :  { %284 = vmatpush.bf16.msra.mxu1 %v1609_v23  ;;  %v1680_v21 = vld [vmem:[%s1931_s16 + $0x28] sm:$0xff]  ;;  %v1678_v31 = vld [vmem:[%s1931_s16 + $0x18] sm:$0xff] }
  0x28   :  { %485 = vmatpush.bf16.msrb.mxu0 %v1630_v24  ;;  %v1658_v24 = vld [vmem:[%s1919_s11] sm:$0xff] }
  0x29   :  { %772 = vmatpush.bf16.msrb.mxu3 %v1655_v34  ;;  %536 = vmatpush.bf16.msrb.mxu2 %v1637_v63  ;;  %v1735_v63 = vld [vmem:[%s1902_s27] ss:$0 sm:$0xff]  ;;  %s1772_s27 = smov 32  }
  0x2a   :  { %668 = vmatpush.bf16.msrb.mxu1 %v1650_v58  ;;  %s1989_s12 = sld [smem:[%s2006_s0 + %s1772_s27]]  }
  0x2b   :  { %v1669_v57 = vld [vmem:[%s1230_s5 + $0x18] sm:$0xff]  ;;  %v1667_v61 = vld [vmem:[%s1230_s5 + $0x8] sm:$0xff] }
  0x2c   :  { %486 = vmatpush.bf16.msrb.mxu0 %v1629_v25 }
  0x2d   :  { %964 = vmatpush.bf16.msra.mxu3 %v1674_v35  ;;  %537 = vmatpush.bf16.msrb.mxu2 %v1636_v2  ;;  %v1677_v35 = vld [vmem:[%s1931_s16 + $0x10] sm:$0xff] }
  0x2e   :  { %669 = vmatpush.bf16.msrb.mxu1 %v1649_v60  ;;  %v1668_v60 = vld [vmem:[%s1230_s5 + $0x10] sm:$0xff] }
  0x30   :  { %487 = vmatpush.bf16.msrb.mxu0 %v1628_v26  ;;  %1460 = vmatmul.msk.bf16.vlgmr.msrb.gmra.mxu3 %vm761_vm2, %v732_v41  ;;  %v1679_v26 = vld [vmem:[%s1931_s16 + $0x20] sm:$0xff] }
  0x31   :  { %965 = vmatpush.bf16.msra.mxu3 %v1673_v42  ;;  %538 = vmatpush.bf16.msrb.mxu2 %v1635_v5  ;;  %v1675_v41 = vld [vmem:[%s1931_s16] sm:$0xff] }
  0x32   :  { %670 = vmatpush.bf16.msrb.mxu1 %v1648_v62  ;;  %v1732_v42 = vld [vmem:[%s1886_s15] ss:$0 sm:$0xff]  ;;  %s1963_s15 = sld [smem:[%s2006_s0 + %s1767_s19]]  }
  0x33   :  { %v1736_v5 = vld [vmem:[%s1957_s17] ss:$0 sm:$0xff] }
  0x34   :  { %488 = vmatpush.bf16.msrb.mxu0 %v1627_v27 }
  0x35   :  { %966 = vmatpush.bf16.msra.mxu3 %v1672_v43 }
  0x36   :  { %671 = vmatpush.bf16.msrb.mxu1 %v1647_v0 }
  0x38   :  { %589 = vmatpush.bf16.msra.mxu0 %v1642_v28 }
  0x39   :  { %967 = vmatpush.bf16.msra.mxu3 %v1671_v48  ;;  %v1734_v48 = vld [vmem:[%s1897_s23] ss:$0 sm:$0xff] }
  0x3a   :  { %672 = vmatpush.bf16.msrb.mxu1 %v1646_v3 }
  0x3c   :  { %590 = vmatpush.bf16.msra.mxu0 %v1641_v29  ;;  %v1731_v29 = vld [vmem:[%s1877_s6] ss:$0 sm:$0xff]  ;;  %s1237_s6 = sld [smem:[%s2006_s0 + %s1773_s13]]  }
  0x3d   :  { %968 = vmatpush.bf16.msra.mxu3 %v1670_v51 }
  0x3e   :  { %673 = vmatpush.bf16.msrb.mxu1 %v1645_v6 }
  0x40   :  { %591 = vmatpush.bf16.msra.mxu0 %v1640_v32  ;;  %1530 = vmatmul.msk.bf16.vlgmr.msra.gmra.mxu3 %vm957_vm3, %v912_v54  ;;  %v1653_v54 = vld [vmem:[%s1225_s30 + $0x10] sm:$0xff] }
  0x42   :  { %674 = vmatpush.bf16.msrb.mxu1 %v1644_v8 }
  0x44   :  { %592 = vmatpush.bf16.msra.mxu0 %v1639_v36 }
  0x46   :  { %675 = vmatpush.bf16.msrb.mxu1 %v1643_v10  ;;  %v1686_v10 = vld [vmem:[%s1235_s10 + $0x18] sm:$0xff] }
  0x94   :  { %v203_v37 = vpop.f32.mrf.mxu0 }
  0x95   :  { %v204_v38 = vadd.f32 %v1728_v33, %v203_v37  ;;  %v1676_v37 = vld [vmem:[%s1931_s16 + $0x8] sm:$0xff] }
  0x97   :  { %v207_v39 = vmax.f32 %v204_v38, 0.0 }
  0x99   :  { %v208_v40 = vpack.c.bf16 %v207_v39, %v207_v39 }
  0x9b   :  { %285 = vmatmul.bf16.vlgmr.msra.gmra.mxu1 %v208_v40 }
  0x9c   :  { %v205_v45 = vpop.f32.mrf.mxu0  ;;  %1044 = vmatpush.bf16.msra.mxu1 %v1682_v13 }
  0xa0   :  { %1045 = vmatpush.bf16.msra.mxu1 %v1681_v17 }
  0xa3   :  { %v407_v49 = vpop.f32.mrf.mxu3 }
  0xa4   :  { %v408_v50 = vadd.f32 %v1729_v47, %v407_v49  ;;  %1046 = vmatpush.bf16.msra.mxu1 %v1680_v21  ;;  %v1738_v21 = vld [vmem:[%s1968_s26] ss:$0 sm:$0xff] }
  0xa6   :  { %v411_v52 = vmax.f32 %v408_v50, 0.0 }
  0xa8   :  { %v412_v53 = vpack.c.bf16 %v411_v52, %v411_v52  ;;  %1047 = vmatpush.bf16.msra.mxu1 %v1679_v26  ;;  %v1122_v26 = vld [vmem:[%s1237_s6 + $0x30] sm:$0x3] }
  0xaa   :  { %489 = vmatmul.bf16.vlgmr.msrb.gmra.mxu0 %v412_v53  ;;  %v1654_v53 = vld [vmem:[%s1225_s30 + $0x18] sm:$0xff] }
  0xab   :  { %v409_v55 = vpop.f32.mrf.mxu3  ;;  %848 = vmatpush.bf16.msrb.mxu0 %v1665_v1  ;;  %v1666_v1 = vld [vmem:[%s1230_s5] sm:$0xff] }
  0xac   :  { %1048 = vmatpush.bf16.msra.mxu1 %v1678_v31  ;;  %v1652_v55 = vld [vmem:[%s1225_s30 + $0x8] sm:$0xff]  ;;  %v1691_v31 = vld [vmem:[%s1237_s6 + $0x20] sm:$0xff] }
  0xaf   :  { %849 = vmatpush.bf16.msrb.mxu0 %v1664_v4 }
  0xb0   :  { %1049 = vmatpush.bf16.msra.mxu1 %v1677_v35 }
  0xb3   :  { %850 = vmatpush.bf16.msrb.mxu0 %v1663_v7  ;;  %v774_v23 = vpop.f32.mrf.mxu3 }
  0xb4   :  { %v775_v25 = vadd.f32 %v1733_v22, %v774_v23  ;;  %1050 = vmatpush.bf16.msra.mxu1 %v1676_v37 }
  0xb6   :  { %v778_v28 = vmax.f32 %v775_v25, 0.0 }
  0xb7   :  { %851 = vmatpush.bf16.msrb.mxu0 %v1662_v9 }
  0xb8   :  { %v779_v30 = vpack.c.bf16 %v778_v28, %v778_v28  ;;  %1051 = vmatpush.bf16.msra.mxu1 %v1675_v41 }
  0xba   :  { %1398 = vmatmul.msk.bf16.vlgmr.msra.gmra.mxu0 %vm190_vm0, %v545_v56  ;;  %v1651_v56 = vld [vmem:[%s1225_s30] sm:$0xff] }
  0xbb   :  { %852 = vmatpush.bf16.msrb.mxu0 %v1661_v12  ;;  %v776_v33 = vpop.f32.mrf.mxu3  ;;  %v1737_v12 = vld [vmem:[%s1963_s15] ss:$0 sm:$0xff] }
  0xbc   :  { %v1689_v33 = vld [vmem:[%s1237_s6 + $0x10] sm:$0xff] }
  0xbf   :  { %853 = vmatpush.bf16.msrb.mxu0 %v1660_v16  ;;  %v1684_v16 = vld [vmem:[%s1235_s10 + $0x8] sm:$0xff] }
  0xc3   :  { %854 = vmatpush.bf16.msrb.mxu0 %v1659_v20  ;;  %v970_v40 = vpop.f32.mrf.mxu3 }
  0xc4   :  { %v971_v50 = vadd.f32 %v1734_v48, %v970_v40  ;;  %v1739_v48 = vld [vmem:[%s1989_s12] ss:$0 sm:$0xff] }
  0xc6   :  { %v974_v51 = vmax.f32 %v971_v50, 0.0 }
  0xc7   :  { %855 = vmatpush.bf16.msrb.mxu0 %v1658_v24 }
  0xc8   :  { %v975_v52 = vpack.c.bf16 %v974_v51, %v974_v51  ;;  %v1740_v51 = vld [vmem:[%s1239_s20] ss:$0 sm:$0xff] }
  0xca   :  { %856 = vmatmul.bf16.vlgmr.msrb.gmra.mxu0 %v779_v30  ;;  %v1692_v30 = vld [vmem:[%s1237_s6 + $0x28] sm:$0xff] }
  0xcb   :  { %v972_v44 = vpop.f32.mrf.mxu3 }
 0x118   :  { %v286_v14 = vpop.f32.mrf.mxu1 }
 0x119   :  { %v287_v15 = vadd.f32 %v1730_v11, %v286_v14  ;;  %v1685_v14 = vld [vmem:[%s1235_s10 + $0x10] sm:$0xff] }
 0x11b   :  { %v290_v18 = vmax.f32 %v287_v15, 0.0 }
 0x11d   :  { %v291_v19 = vpack.c.bf16 %v290_v18, %v290_v18 }
 0x11f   :  { %1307 = vmatmul.msk.bf16.vlgmr.msra.gmra.mxu2 %vm190_vm0, %v291_v19  ;;  %v1683_v19 = vld [vmem:[%s1235_s10] sm:$0xff] }
 0x120   :  { %v288_v27 = vpop.f32.mrf.mxu1  ;;  %722 = vmatpush.bf16.msra.mxu2 %v1654_v53 }
 0x121   :  { %v1152_v27 = vunpack.c.l.b16 %v1122_v26 }
 0x123   :  { %v1159_v28 = vpack.c.b16 %v1152_v27, %v1152_v27 }
 0x124   :  { %723 = vmatpush.bf16.msra.mxu2 %v1653_v54 }
 0x127   :  { %v490_v32 = vpop.f32.mrf.mxu0 }
 0x128   :  { %v491_v34 = vadd.f32 %v1731_v29, %v490_v32  ;;  %724 = vmatpush.bf16.msra.mxu2 %v1652_v55  ;;  %v1172_v29 = vsel %vm1170_vm4, %v1159_v28, 0  ;;  %v1690_v32 = vld [vmem:[%s1237_s6 + $0x18] sm:$0xff] }
 0x129   :  { %1175 = vmatpush.bf16.msrb.mxu3 %v1172_v29 }
 0x12a   :  { %v494_v36 = vmax.f32 %v491_v34, 0.0  ;;  %v1688_v34 = vld [vmem:[%s1237_s6 + $0x8] sm:$0xff] }
 0x12c   :  { %v495_v38 = vpack.c.bf16 %v494_v36, %v494_v36  ;;  %725 = vmatpush.bf16.msra.mxu2 %v1651_v56  ;;  %v1687_v36 = vld [vmem:[%s1237_s6] sm:$0xff] }
 0x12d   :  { %1176 = vmatpush.bf16.msrb.mxu3 %v1692_v30 }
 0x12f   :  { %v492_v39 = vpop.f32.mrf.mxu0  ;;  %1381 = vmatmul.msk.bf16.vlgmr.msrb.gmra.mxu2 %vm190_vm0, %v495_v38 }
 0x130   :  { %902 = vmatpush.bf16.msrb.mxu2 %v1669_v57 }
 0x131   :  { %1177 = vmatpush.bf16.msrb.mxu3 %v1691_v31 }
 0x134   :  { %903 = vmatpush.bf16.msrb.mxu2 %v1668_v60 }
 0x135   :  { %1178 = vmatpush.bf16.msrb.mxu3 %v1690_v32 }
 0x137   :  { %v594_v43 = vpop.f32.mrf.mxu0 }
 0x138   :  { %v595_v45 = vadd.f32 %v1732_v42, %v594_v43  ;;  %904 = vmatpush.bf16.msrb.mxu2 %v1667_v61 }
 0x139   :  { %1179 = vmatpush.bf16.msrb.mxu3 %v1689_v33 }
 0x13a   :  { %v598_v46 = vmax.f32 %v595_v45, 0.0 }
 0x13c   :  { %v599_v47 = vpack.c.bf16 %v598_v46, %v598_v46  ;;  %905 = vmatpush.bf16.msrb.mxu2 %v1666_v1 }
 0x13d   :  { %1180 = vmatpush.bf16.msrb.mxu3 %v1688_v34 }
 0x13e   :  { %676 = vmatmul.bf16.vlgmr.msrb.gmra.mxu1 %v599_v47  ;;  %v76_v47 = vstv %s1240_s24 }
 0x13f   :  { %v596_v49 = vpop.f32.mrf.mxu0  ;;  %77 = vst [vmem:[#allocation2] sm:$0x1] %v76_v47 }
 0x141   :  { %1181 = vmatpush.bf16.msrb.mxu3 %v1687_v36 }
 0x146   :  { %v1741_v56 = vld [vmem:[#allocation2] ss:$0 sm:$0xff] }
 0x147   :  { %v857_v59 = vpop.f32.mrf.mxu0 }
 0x148   :  { %v858_v15 = vadd.f32 %v1737_v12, %v857_v59 }
 0x14a   :  { %v861_v17 = vmax.f32 %v858_v15, 0.0 }
 0x14c   :  { %v862_v20 = vpack.c.bf16 %v861_v17, %v861_v17 }
 0x14e   :  { %1052 = vmatmul.bf16.vlgmr.msra.gmra.mxu1 %v975_v52 }
 0x14f   :  { %v859_v0 = vpop.f32.mrf.mxu0 }
 0x1a2   :  { %v336_v58 = vpop.f32.mrf.mxu2 }
 0x1a3   :  { %v340_v2 = vadd.f32 %v1735_v63, %v336_v58 }
 0x1aa   :  { %v338_v62 = vpop.f32.mrf.mxu2 }
 0x1b2   :  { %v540_v3 = vpop.f32.mrf.mxu2 }
 0x1b3   :  { %v544_v4 = vadd.f32 %v540_v3, %v340_v2 }
 0x1ba   :  { %v542_v6 = vpop.f32.mrf.mxu2 }
 0x1bb   :  { %v677_v7 = vpop.f32.mrf.mxu1 }
 0x1bc   :  { %v678_v8 = vadd.f32 %v1736_v5, %v677_v7 }
 0x1be   :  { %v681_v9 = vmax.f32 %v678_v8, 0.0 }
 0x1c0   :  { %v682_v11 = vpack.c.bf16 %v681_v9, %v681_v9 }
 0x1c2   :  { %1447 = vmatmul.msk.bf16.vlgmr.msra.gmra.mxu2 %vm190_vm0, %v682_v11 }
 0x1c3   :  { %v679_v13 = vpop.f32.mrf.mxu1  ;;  %1098 = vmatpush.bf16.msra.mxu2 %v1686_v10 }
 0x1c7   :  { %1099 = vmatpush.bf16.msra.mxu2 %v1685_v14 }
 0x1cb   :  { %v1053_v18 = vpop.f32.mrf.mxu1  ;;  %1100 = vmatpush.bf16.msra.mxu2 %v1684_v16 }
 0x1cc   :  { %v1054_v23 = vadd.f32 %v1738_v21, %v1053_v18 }
 0x1ce   :  { %v1057_v24 = vmax.f32 %v1054_v23, 0.0 }
 0x1cf   :  { %1101 = vmatpush.bf16.msra.mxu2 %v1683_v19 }
 0x1d0   :  { %v1058_v25 = vpack.c.bf16 %v1057_v24, %v1057_v24 }
 0x1d2   :  { %1509 = vmatmul.msk.bf16.vlgmr.msrb.gmra.mxu2 %vm190_vm0, %v862_v20 }
 0x1d3   :  { %v1055_v22 = vpop.f32.mrf.mxu1 }
 0x1e2   :  { %1579 = vmatmul.msk.bf16.vlgmr.msra.gmra.mxu2 %vm190_vm0, %v1058_v25 }
 0x245   :  { %v727_v35 = vpop.f32.mrf.mxu2 }
 0x246   :  { %v731_v40 = vadd.f32 %v727_v35, %v544_v4 }
 0x24d   :  { %v729_v37 = vpop.f32.mrf.mxu2 }
 0x255   :  { %v907_v38 = vpop.f32.mrf.mxu2 }
 0x256   :  { %v911_v41 = vadd.f32 %v907_v38, %v731_v40 }
 0x25d   :  { %v909_v39 = vpop.f32.mrf.mxu2 }
 0x265   :  { %v1103_v42 = vpop.f32.mrf.mxu2 }
 0x266   :  { %v1107_v43 = vadd.f32 %v1103_v42, %v911_v41 }
 0x268   :  { %v1108_v44 = vmax.f32 %v1107_v43, 0.0 }
 0x26a   :  { %v1109_v45 = vpack.c.bf16 %v1108_v44, %v1108_v44 }
 0x26c   :  { %1604 = vmatmul.msk.bf16.vlgmr.msrb.gmra.mxu3 %vm1166_vm5, %v1109_v45 }
 0x26d   :  { %v1105_v46 = vpop.f32.mrf.mxu2 }
 0x2ef   :  { %v1183_v49 = vpop.f32.mrf.mxu3 }
 0x2f0   :  { %v1184_v50 = vadd.f32 %v1739_v48, %v1183_v49 }
 0x2f2   :  { %v1187_v52 = vmax.f32 %v1184_v50, 0.0 }
 0x2f4   :  { %v1192_v53 = vmul.f32 %v1740_v51, %v1187_v52 }
 0x2f6   :  { %v1193_v54 = vsel %vm1166_vm5, %v1192_v53, 0.0 }
 0x2f7   :  { %v1185_v55 = vpop.f32.mrf.mxu3  ;;  %1194 = vadd.xlane.f32.xlu0 %v1193_v54 }
 0x36a   :  { %v1195_v57 = vpop.xlane.xlu0 %1194 }
 0x36b   :  { %v1200_v58 = vadd.f32 %v1741_v56, %v1195_v57 }
 0x36d   :  { %1202 = vst.msk [vmem:[%s1241_s29] sm:$0xff] %vm1201_vm6, %v1200_v58 }

</bundles_post_ra>
